<compile_context>
chip_gen: v7x
topology: tpu7x:2x2x1
jax: 0.10.0
libtpu: 0.0.40
codegen_flags: <defaults>
</compile_context>

<pallas_src>
import functools

import jax
import jax.numpy as jnp
from jax.experimental import pallas as pl
from jax.experimental.pallas import tpu as pltpu

_MAX_BATCH_TILE = 8192          # per-step DMA ~1-4 us -> step overhead <10%
_TARGET_GRID_STEPS = 4          # keep >=2 steps so v7x's 2 TCs both get work
_PALLAS_BATCH_THRESHOLD = 1024  # below this, plain XLA matmul is faster


def _round_up(v, m):
    return ((v + m - 1) // m) * m


def _decoder_kernel(x_ref, w_ref, b_ref, o_ref):
    """One batch tile of y = x @ W_t + b.

    x_ref: (tb, latent)      bf16 batch tile (pipelined over the grid)
    w_ref: (latent, obs_dim) bf16 VMEM-resident weight (pre-transposed)
    b_ref: (1, obs_dim)      f32  VMEM-resident bias
    o_ref: (tb, obs_dim)     f32  unpadded output tile
    """
    y = jnp.dot(x_ref[...], w_ref[...], preferred_element_type=jnp.float32)
    o_ref[...] = y + b_ref[...]          # f32 epilogue (v5e VALU has no bf16)


def prepare_decoder_params(weight, bias):
    """One-time parameter prep (hoisted out of the per-call path).

    weight: (obs_dim, latent_dim)  -- PyTorch nn.Linear layout
    bias:   (obs_dim,)
    Returns (w_t, b2d): bf16 (latent_dim, obs_dim) weight and f32 (1, obs_dim) bias.
    """
    w_t = jnp.asarray(weight).astype(jnp.bfloat16).T     # (latent, obs)
    b2d = jnp.asarray(bias).astype(jnp.float32).reshape(1, -1)
    return w_t, b2d


@functools.partial(jax.jit, static_argnames=())
def _decoder_forward_pallas(x, w_t, b2d):
    """x: (B, latent); w_t: (latent, obs_dim) bf16; b2d: (1, obs_dim) f32."""
    B, latent_dim = x.shape
    obs_dim = w_t.shape[1]

    x = x.astype(jnp.bfloat16)

    # Batch tile: big enough to amortize per-step overhead, small enough to
    # leave >= _TARGET_GRID_STEPS steps (v7x megacore sharding).  Always a
    # multiple of 8 sublanes, or the full batch (block == full dim is legal).
    tb = min(_MAX_BATCH_TILE, _round_up(pl.cdiv(B, _TARGET_GRID_STEPS), 8))
    if tb >= B:
        tb = B
    grid = (pl.cdiv(B, tb),)

    cost = pl.CostEstimate(
        flops=2 * B * latent_dim * obs_dim,
        transcendentals=0,
        bytes_accessed=(x.size * 2            # bf16 activations
                        + w_t.size * 2        # bf16 weight (resident)
                        + b2d.size * 4        # f32 bias
                        + B * obs_dim * 4),   # f32 output, unpadded
    )

    return pl.pallas_call(
        _decoder_kernel,
        out_shape=jax.ShapeDtypeStruct((B, obs_dim), jnp.float32),
        grid=grid,
        in_specs=[
            pl.BlockSpec((tb, latent_dim), lambda i: (i, 0)),       # x: batch-tiled
            pl.BlockSpec((latent_dim, obs_dim), lambda i: (0, 0)),  # weight: resident
            pl.BlockSpec((1, obs_dim), lambda i: (0, 0)),           # bias: resident
        ],
        out_specs=pl.BlockSpec((tb, obs_dim), lambda i: (i, 0)),    # unpadded output
        compiler_params=pltpu.CompilerParams(
            dimension_semantics=("parallel",)),
        cost_estimate=cost,
    )(x, w_t, b2d)


def decoder_forward(x, weight, bias, *, use_pallas=None):
    """Decoder.forward: y = x @ weight.T + bias  (weight in PyTorch layout).

    use_pallas=None auto-dispatches: tiny batches use a plain fused XLA matmul
    (Pallas launch overhead dwarfs ~4K FLOPs there); large batches use the
    tiled, pipelined Pallas kernel.
    """
    B = x.shape[0]
    if use_pallas is None:
        use_pallas = B >= _PALLAS_BATCH_THRESHOLD
    if not use_pallas:
        return (x.astype(jnp.float32) @ jnp.asarray(weight).astype(jnp.float32).T
                + jnp.asarray(bias).astype(jnp.float32))
    w_t, b2d = prepare_decoder_params(weight, bias)
    return _decoder_forward_pallas(x, w_t, b2d)


if __name__ == "__main__":
    # Shapes consistent with the module: latent_dim=32, obs_dim=16.
    latent_dim, obs_dim, batch = 32, 16, 8

    key = jax.random.PRNGKey(0)
    kx, kw, kb, kx2 = jax.random.split(key, 4)

    # Deterministic param init (mimics nn.Linear uniform(-1/sqrt(in), 1/sqrt(in)))
    bound = 1.0 / jnp.sqrt(jnp.float32(latent_dim))
    weight = jax.random.uniform(kw, (obs_dim, latent_dim), jnp.float32,
                                minval=-bound, maxval=bound)
    bias = jax.random.uniform(kb, (obs_dim,), jnp.float32,
                              minval=-bound, maxval=bound)
    x = jax.random.normal(kx, (batch, latent_dim), jnp.float32)

    # Reference matching the kernel's declared precision (bf16 inputs,
    # f32 accumulate / epilogue).
    def ref_fn(xin):
        xb = xin.astype(jnp.bfloat16).astype(jnp.float32)
        wb = weight.astype(jnp.bfloat16).astype(jnp.float32)
        return xb @ wb.T + bias

    # 1) Force the Pallas path at the module's small shapes (single grid step).
    y = decoder_forward(x, weight, bias, use_pallas=True)
    jax.block_until_ready(y)
    assert y.shape == (batch, obs_dim)
    assert jnp.allclose(y, ref_fn(x), atol=1e-4, rtol=1e-4)
    # Loose check vs. full-precision f32 reference (accepted bf16 trade-off).
    assert jnp.allclose(y, x @ weight.T + bias, atol=5e-2, rtol=5e-2)

    # 2) Larger batch exercises auto-dispatch -> Pallas path with batch tiling
    #    (multi-step "parallel" grid, weight/bias resident across steps).
    big_batch = 4096
    x_big = jax.random.normal(kx2, (big_batch, latent_dim), jnp.float32)
    y_big = decoder_forward(x_big, weight, bias)
    jax.block_until_ready(y_big)
    assert y_big.shape == (big_batch, obs_dim)
    assert jnp.allclose(y_big, ref_fn(x_big), atol=1e-4, rtol=1e-4)

    # 3) Tiny-batch auto-dispatch (plain XLA fused matmul) still matches.
    y_small = decoder_forward(x, weight, bias)
    jax.block_until_ready(y_small)
    assert jnp.allclose(y_small, x @ weight.T + bias, atol=1e-5, rtol=1e-5)

    print("KERNEL_OK")
</pallas_src>

<mosaic_0001>
module attributes {stable_mosaic.version = 11 : i64} {
  func.func @_decoder_kernel(%arg0: i32, %arg1: memref<8x32xbf16, #tpu.memory_space<vmem>>, %arg2: memref<32x16xbf16, #tpu.memory_space<vmem>>, %arg3: memref<1x16xf32, #tpu.memory_space<vmem>>, %arg4: memref<8x16xf32, #tpu.memory_space<vmem>>) attributes {dimension_semantics = [#tpu.dimension_semantics<parallel>], iteration_bounds = array<i64: 1>, scalar_prefetch = 0 : i64, scratch_operands = 0 : i64, tpu.core_type = #tpu.core_type<tc>, window_params = [{transform_indices = @transform_0, window_bounds = array<i64: 8, 32>}, {pipeline_mode = #tpu.pipeline_mode<synchronous>, transform_indices = @transform_1, window_bounds = array<i64: 32, 16>}, {pipeline_mode = #tpu.pipeline_mode<synchronous>, transform_indices = @transform_2, window_bounds = array<i64: 1, 16>}, {transform_indices = @transform_3, window_bounds = array<i64: 8, 16>}]} {
    %c0 = arith.constant 0 : index
    %c0_0 = arith.constant 0 : index
    %0 = vector.load %arg1[%c0, %c0_0] : memref<8x32xbf16, #tpu.memory_space<vmem>>, vector<8x32xbf16>
    %c0_1 = arith.constant 0 : index
    %c0_2 = arith.constant 0 : index
    %1 = vector.load %arg2[%c0_1, %c0_2] : memref<32x16xbf16, #tpu.memory_space<vmem>>, vector<32x16xbf16>
    %cst = arith.constant dense<0.000000e+00> : vector<8x16xf32>
    %2 = tpu.matmul %0, %1, %cst {dimension_numbers = #tpu.dot_dimension_numbers<[1], [0], [0], [1], [0, 0, 1, 1], [], []>} : vector<8x32xbf16>, vector<32x16xbf16>, vector<8x16xf32> -> vector<8x16xf32>
    %c0_3 = arith.constant 0 : index
    %c0_4 = arith.constant 0 : index
    %3 = vector.load %arg3[%c0_3, %c0_4] : memref<1x16xf32, #tpu.memory_space<vmem>>, vector<1x16xf32>
    %4 = vector.broadcast %3 : vector<1x16xf32> to vector<8x16xf32>
    %5 = arith.addf %2, %4 : vector<8x16xf32>
    %c0_5 = arith.constant 0 : index
    %c0_6 = arith.constant 0 : index
    %6 = vector.load %arg4[%c0_5, %c0_6] : memref<8x16xf32, #tpu.memory_space<vmem>>, vector<8x16xf32>
    tpu.vector_store %arg4[%c0_5, %c0_6], %5 {strides = array<i32>} : memref<8x16xf32, #tpu.memory_space<vmem>>, vector<8x16xf32>,
    return
  }
  func.func @transform_0(%arg0: i32) -> (i32, i32) {
    %c0_i32 = arith.constant 0 : i32
    %c0_i32_0 = arith.constant 0 : i32
    return %arg0, %c0_i32 : i32, i32
  }
  func.func @transform_1(%arg0: i32) -> (i32, i32) {
    %c0_i32 = arith.constant 0 : i32
    %c0_i32_0 = arith.constant 0 : i32
    %c0_i32_1 = arith.constant 0 : i32
    return %c0_i32, %c0_i32_0 : i32, i32
  }
  func.func @transform_2(%arg0: i32) -> (i32, i32) {
    %c0_i32 = arith.constant 0 : i32
    %c0_i32_0 = arith.constant 0 : i32
    %c0_i32_1 = arith.constant 0 : i32
    return %c0_i32, %c0_i32_0 : i32, i32
  }
  func.func @transform_3(%arg0: i32) -> (i32, i32) {
    %c0_i32 = arith.constant 0 : i32
    %c0_i32_0 = arith.constant 0 : i32
    return %arg0, %c0_i32 : i32, i32
  }
}

</mosaic_0001>

<bundles_post_ra>
// kernel: _decoder_forward_pallas.1
= control target key start
LH: loop header
LB: loop body
LE: loop exit
PB: predicated region body
PF: predicated region fallthrough
CT: control target
= control target key end

     0   :  { %v144_v1 = vmov 0.0   ;;  %vm145_vm0 = vmmov 0   ;;  %s191_s0 = inlined_call_operand.vmem [shape: bf16[8,32], index: 0, kind: input, shape index: {}]   ;;  %s192_s1 = inlined_call_operand.vmem [shape: bf16[32,16], index: 1, kind: input, shape index: {}]   ;;  %s193_s2 = inlined_call_operand.vmem [shape: f32[1,16], index: 2, kind: input, shape index: {}]   ;;  %s194_s3 = inlined_call_operand.hbm [shape: f32[8,16], index: 3, kind: output, shape index: {}]  }
   0x1   :  { %v118_v0 = vld [vmem:[%s192_s1] sm:$0xff]   ;;  %107 = vmatprep.subr.bf16.mxu0 %v144_v1  ;;  %v119_v2 = vld [vmem:[%s192_s1 + $0x8] sm:$0xff]   ;;  %111 = vmatprep.mubr.msk.bf16.mxu0 %vm145_vm0, %v144_v1 }
   0x2   :  { %108 = vmatpush3.bf16.msra.mxu0 %v118_v0 }
   0x3   :  { %109 = vmatprep.subr.bf16.mxu0 %v144_v1 }
   0x4   :  { %8 = vsyncpa [#allocation3], 0  ;;  %v16_v3 = vld [vmem:[%s191_s0] sm:$0xf]  ;;  %vm40_vm1 = vcmask 261120   ;;  %s146_s20 = smov [#allocation2]  }
   0x5   :  { %v100_v4 = vld [vmem:[%s193_s2] ss:$0 sm:$0xff]  ;;  %s92_s21 = sshll.u32 %s146_s20, 4  ;;  %vm84_vm2 = vcmask 130048   ;;  %s93_s21 = int_to_ptr.vmem [resolvable:$true] %s92_s21 }
   0x6   :  { %110 = vmatpush3.bf16.msra.mxu0 %v119_v2  ;;  %s120_s1 = scalar_lea.vmem %s93_s21, 128  ;;  %p125_p1 = scmp.lt.s32.totalorder %s93_s21, %s93_s21 }
   0x7   :  { %p121_p0 = scmp.ne.s32.totalorder %s93_s21, %s120_s1  ;;  %p126_p2 = scmp.lt.s32.totalorder %s120_s1, %s120_s1 }
   0x9   :  { %112 = vmatmul.mubr.msk.bf16.vlgmr.msra.gmra.mrb[0].mxu0 %vm40_vm1, %v16_v3  ;;  %p127_p3 = por %p126_p2, %p125_p1 }
   0xb   :  { %p128_p4 = pnand %p127_p3, %p121_p0 }
  0xdc   :  { %v78_v5 = vpop.f32.mrb[0].mxu0 }
  0xdd   :  { %v79_v6 = vadd.f32 %v100_v4, %v78_v5  ;;  %v113_v7 = vpop.f32.mrb[1].mxu0 }
  0xde   :  { %v81_v8 = vpop.f32.mrb[2].mxu0 }
  0xdf   :  { %v114_v9 = vpop.f32.mrb[3].mxu0  ;;  %85 = vst.msk [vmem:[#allocation2] sm:$0xff] %vm84_vm2, %v79_v6 }
  0xe0   :  { %131 = shalt.err (!%p128_p4)
}
  0xe1   :  { %s132_s2 = scalar_lea.hbm %s194_s3, 128 }
  0xe2   :  { %p133_p5 = scmp.ne.s32.totalorder %s194_s3, %s132_s2  ;;  %p136_p6 = scmp.lt.u32.totalorder %s132_s2, %s194_s3 }
  0xe4   :  { %p138_p7 = pnand %p136_p6, %p133_p5 }
  0xe6   :  { %141 = shalt.err (!%p138_p7)
}
  0xe7   :  { %95 = dma.vmem_to_hbm [thread:$0]  %s93_s21, 128, %s194_s3, [#allocation3]  }
  0xe8   :  { %142 = dma.done.wait [#allocation3], 128  }
  0xe9   :  { %143 = vsyncadd [#allocation3], 4294967168 }
  0xea   :  { %99 = vsyncpa [#allocation3], 1 }

</bundles_post_ra>
